<compile_context>
chip_gen: v6e
topology: v6e:2x2x1
jax: 0.10.0
libtpu: 0.0.40
codegen_flags: <defaults>
</compile_context>

<pallas_src>
import jax
import jax.numpy as jnp
from jax.experimental import pallas as pl
from jax.experimental.pallas import tpu as pltpu

_SOFTPLUS_THRESHOLD = 20.0          # PyTorch nn.Softplus default threshold
_MAX_TILE_BYTES = 4 << 20           # per-buffer tile cap: 4 MiB
_RAGGED_BLOCK_LANES = 128 * 512     # 65536-elem lane blocks for the (1, n) path
_VMEM_LIMIT_BYTES = 32 << 20        # covers 2x(in+out) double-buffered tiles


def _aglu_kernel(params_ref, x_ref, o_ref):
    """params_ref: SMEM f32[3] = [kappa, log(lam), exp(1/lam)] (hoisted)."""
    kappa = params_ref[0]
    log_lam = params_ref[1]
    scale = params_ref[2]
    # f32 compute: required on v5e (no bf16 VPU/EUP), safe everywhere.
    # TODO(synk): on v7x with bf16 inputs a bf16 softplus path would keep the
    # kernel HBM-bound if a bundle dump shows the EUP slot saturating.
    x = x_ref[...].astype(jnp.float32)
    z = kappa * x - log_lam
    # Softplus(beta=1) with PyTorch's threshold=20: identity for z > 20.
    sp = jnp.where(z > _SOFTPLUS_THRESHOLD, z,
                   jnp.log1p(jnp.exp(jnp.minimum(z, _SOFTPLUS_THRESHOLD))))
    o_ref[...] = (scale * sp).astype(o_ref.dtype)


def _round_up(a, m):
    return ((a + m - 1) // m) * m


def aglu_forward(x, lambd, kappa):
    """AGLU forward. x: any-shape float array. lambd/kappa: shape-(1,) params."""
    orig_shape = x.shape
    orig_dtype = x.dtype

    # f32/bf16/f16 stream through the DMA in their native dtype (no wrapper
    # cast). Anything else (e.g. f64 with x64 enabled) is computed in f32 and
    # cast back — documented extra HBM pass for that uncommon case.
    passthrough = (jnp.dtype(jnp.float32), jnp.dtype(jnp.bfloat16),
                   jnp.dtype(jnp.float16))
    io_dtype = (jnp.dtype(orig_dtype) if jnp.dtype(orig_dtype) in passthrough
                else jnp.dtype(jnp.float32))

    # Scalar math hoisted out of the kernel (runs once, not per grid step).
    lam = jnp.maximum(jnp.asarray(lambd, jnp.float32).reshape(-1)[0],
                      jnp.float32(1e-4))
    kap = jnp.asarray(kappa, jnp.float32).reshape(-1)[0]
    params = jnp.stack([kap, jnp.log(lam), jnp.exp(1.0 / lam)])

    flat = x.reshape(-1)
    if flat.dtype != io_dtype:
        flat = flat.astype(io_dtype)
    n = flat.shape[0]
    if n == 0:
        return x

    itemsize = jnp.dtype(io_dtype).itemsize
    cost = pl.CostEstimate(flops=6 * n, transcendentals=2 * n,
                           bytes_accessed=2 * n * itemsize)

    def call(x_arr, block_shape, index_map, grid):
        return pl.pallas_call(
            _aglu_kernel,
            out_shape=jax.ShapeDtypeStruct(x_arr.shape, io_dtype),
            grid=grid,
            in_specs=[
                pl.BlockSpec(memory_space=pltpu.MemorySpace.SMEM),  # params
                pl.BlockSpec(block_shape, index_map),               # x tile
            ],
            out_specs=pl.BlockSpec(block_shape, index_map),
            compiler_params=pltpu.CompilerParams(
                dimension_semantics=("parallel",),
                vmem_limit_bytes=_VMEM_LIMIT_BYTES),
            cost_estimate=cost,
        )(params, x_arr)

    if n % 128 == 0:
        # Lane-dense (rows, 128) slab; big row-blocks amortize the ~0.35 us
        # per-grid-step overhead; partial last row-block is masked by Pallas.
        rows = n // 128
        max_rows = max(8, _MAX_TILE_BYTES // (128 * itemsize))  # 8192 f32 / 16384 bf16
        if rows < 8:
            br = rows                                 # block == full dim
        else:
            # Aim for >= ~4 grid steps so v7x's 2 TensorCores both get work.
            br = min(max_rows, max(8, _round_up(-(-rows // 4), 8)))
        out = call(flat.reshape(rows, 128), (br, 128), lambda i: (i, 0),
                   (pl.cdiv(rows, br),))
    else:
        # Ragged size: (1, n) lane-blocked view (metadata-only reshape, no
        # copy).  Sub-optimal sublane packing, but no pad/slice/concat traffic.
        row = flat.reshape(1, n)
        if n <= _RAGGED_BLOCK_LANES:
            out = call(row, (1, n), lambda i: (0, i), (1,))
        else:
            out = call(row, (1, _RAGGED_BLOCK_LANES), lambda i: (0, i),
                       (pl.cdiv(n, _RAGGED_BLOCK_LANES),))

    return out.reshape(orig_shape).astype(orig_dtype)


def _aglu_reference(x, lambd, kappa):
    """Pure-JAX reference with the same formula as the PyTorch module."""
    lam = jnp.maximum(lambd.astype(jnp.float32).reshape(-1)[0],
                      jnp.float32(1e-4))
    kap = kappa.astype(jnp.float32).reshape(-1)[0]
    z = kap * x.astype(jnp.float32) - jnp.log(lam)
    sp = jnp.where(z > _SOFTPLUS_THRESHOLD, z,
                   jnp.log1p(jnp.exp(jnp.minimum(z, _SOFTPLUS_THRESHOLD))))
    return (jnp.exp(1.0 / lam) * sp).astype(x.dtype)


if __name__ == "__main__":
    key = jax.random.PRNGKey(0)
    kx, kx2, kl, kk = jax.random.split(key, 4)

    # Parameters mimic nn.init.uniform_ on shape (1,); lambd is drawn away
    # from the tiny-lambda regime where exp(1/lambda) overflows f32 so the
    # numeric check stays meaningful.
    lambd = jax.random.uniform(kl, (1,), dtype=jnp.float32,
                               minval=0.25, maxval=1.0)
    kappa = jax.random.uniform(kk, (1,), dtype=jnp.float32)

    fwd = jax.jit(aglu_forward)

    # Conv-style NCHW activation input: 128-aligned fast path, multi-step grid.
    x = jax.random.normal(kx, (2, 4, 16, 16), dtype=jnp.float32)
    y = jax.block_until_ready(fwd(x, lambd, kappa))
    y_ref = _aglu_reference(x, lambd, kappa)
    assert y.shape == x.shape and y.dtype == x.dtype
    assert jnp.allclose(y, y_ref, atol=1e-4, rtol=1e-4)

    # Ragged (non-multiple-of-128) shape exercises the (1, n) path.
    x2 = jax.random.normal(kx2, (3, 5, 7), dtype=jnp.float32)
    y2 = jax.block_until_ready(fwd(x2, lambd, kappa))
    y2_ref = _aglu_reference(x2, lambd, kappa)
    assert y2.shape == x2.shape and y2.dtype == x2.dtype
    assert jnp.allclose(y2, y2_ref, atol=1e-4, rtol=1e-4)

    print("KERNEL_OK")
</pallas_src>

<mosaic_0001>
module attributes {stable_mosaic.version = 11 : i64} {
  func.func @_aglu_kernel(%arg0: i32, %arg1: memref<3xf32, #tpu.memory_space<smem>>, %arg2: memref<8x128xf32, #tpu.memory_space<vmem>>, %arg3: memref<8x128xf32, #tpu.memory_space<vmem>>) attributes {dimension_semantics = [#tpu.dimension_semantics<parallel>], iteration_bounds = array<i64: 2>, scalar_prefetch = 0 : i64, scratch_operands = 0 : i64, tpu.core_type = #tpu.core_type<tc>, window_params = [{transform_indices = @transform_0, window_bounds = array<i64: 3>}, {transform_indices = @transform_1, window_bounds = array<i64: 8, 128>}, {transform_indices = @transform_2, window_bounds = array<i64: 8, 128>}]} {
    %c0 = arith.constant 0 : index
    %0 = memref.load %arg1[%c0] : memref<3xf32, #tpu.memory_space<smem>>
    %c1 = arith.constant 1 : index
    %1 = memref.load %arg1[%c1] : memref<3xf32, #tpu.memory_space<smem>>
    %c2 = arith.constant 2 : index
    %2 = memref.load %arg1[%c2] : memref<3xf32, #tpu.memory_space<smem>>
    %c0_0 = arith.constant 0 : index
    %c0_1 = arith.constant 0 : index
    %3 = vector.load %arg2[%c0_0, %c0_1] : memref<8x128xf32, #tpu.memory_space<vmem>>, vector<8x128xf32>
    %4 = vector.broadcast %0 : f32 to vector<8x128xf32>
    %5 = arith.mulf %4, %3 : vector<8x128xf32>
    %6 = vector.broadcast %1 : f32 to vector<8x128xf32>
    %7 = arith.subf %5, %6 : vector<8x128xf32>
    %cst = arith.constant 2.000000e+01 : f32
    %8 = vector.broadcast %cst : f32 to vector<8x128xf32>
    %9 = arith.cmpf ogt, %7, %8 : vector<8x128xf32>
    %cst_2 = arith.constant 2.000000e+01 : f32
    %10 = vector.broadcast %cst_2 : f32 to vector<8x128xf32>
    %11 = arith.minimumf %7, %10 : vector<8x128xf32>
    %12 = math.exp %11 : vector<8x128xf32>
    %13 = math.log1p %12 : vector<8x128xf32>
    %14 = arith.select %9, %7, %13 : vector<8x128xi1>, vector<8x128xf32>
    %15 = vector.broadcast %2 : f32 to vector<8x128xf32>
    %16 = arith.mulf %15, %14 : vector<8x128xf32>
    %c0_3 = arith.constant 0 : index
    %c0_4 = arith.constant 0 : index
    %17 = vector.load %arg3[%c0_3, %c0_4] : memref<8x128xf32, #tpu.memory_space<vmem>>, vector<8x128xf32>
    tpu.vector_store %arg3[%c0_3, %c0_4], %16 {strides = array<i32>} : memref<8x128xf32, #tpu.memory_space<vmem>>, vector<8x128xf32>,
    return
  }
  func.func @transform_0(%arg0: i32) -> i32 {
    %c0_i32 = arith.constant 0 : i32
    %c0_i32_0 = arith.constant 0 : i32
    return %c0_i32 : i32
  }
  func.func @transform_1(%arg0: i32) -> (i32, i32) {
    %c0_i32 = arith.constant 0 : i32
    %c0_i32_0 = arith.constant 0 : i32
    return %arg0, %c0_i32 : i32, i32
  }
  func.func @transform_2(%arg0: i32) -> (i32, i32) {
    %c0_i32 = arith.constant 0 : i32
    %c0_i32_0 = arith.constant 0 : i32
    return %arg0, %c0_i32 : i32, i32
  }
}

</mosaic_0001>

<bundles_post_ra>
// kernel: aglu_forward.1
= control target key start
LH: loop header
LB: loop body
LE: loop exit
PB: predicated region body
PF: predicated region fallthrough
CT: control target
= control target key end

     0   :  { %7 = vsyncpa [#allocation3], 0  ;;  %s322_s9 = smov 0   ;;  %s353_s0 = inlined_call_operand.vmem [shape: f32[3], index: 0, kind: input, shape index: {}]   ;;  %s354_s1 = inlined_call_operand.vmem [shape: f32[16,128], index: 1, kind: input, shape index: {}]   ;;  %s355_s2 = inlined_call_operand.vmem [shape: f32[16,128], index: 2, kind: output, shape index: {}]  }
   0x1 LB: > { %s243_s10 = sadd.s32 4294967295, %s304_s9   ;;  %p245_p0 = scmp.ge.s32.totalorder %s304_s9, 1  ;;  %s304_s9 = sphi %s322_s9, %s13_s9  }
   0x2   : > { %p91_p1 = scmp.lt.s32.totalorder %s304_s9, 3  ;;  %s104_s13 = sshll.u32 %s353_s0, 4  ;;  %s105_s13 = int_to_ptr.vmem [resolvable:$true] %s104_s13 }
   0x3   : > { %p264_p3 = scmp.eq.s32.totalorder %s243_s10, 0  ;;  %s279_s15 = scalar_lea.vmem %s105_s13, 16 }
   0x4   : > { %p333_p2 = pnand %p245_p0, %p91_p1  ;;  %p280_p6 = scmp.ne.s32.totalorder %s105_s13, %s279_s15 }
   0x5   : > { %p287_p10 = scmp.lt.s32.totalorder %s105_s13, %s105_s13  ;;  %p288_p11 = scmp.lt.s32.totalorder %s279_s15, %s279_s15 }
   0x6   : > { %p260_p4 = pneg %p333_p2 }
   0x7   : > { %p289_p12 = por %p288_p11, %p287_p10 }
   0x8   : > { %p261_p5 = pnand %p264_p3, %p260_p4 }
   0xa   : > { %p281_p7 = pneg %p261_p5 }
   0xc   : > { %p282_p8 = pnand %p281_p7, %p280_p6 }
   0xe   : > { %p283_p9 = pneg %p282_p8 }
  0x10   : > { %p290_p13 = pnand %p289_p12, %p283_p9 }
  0x12   : > { %293 = shalt.err (!%p290_p13)
}
  0x13   : > { %s306_s16 = smov [#allocation2]   ;;  %124 = sbr.rel (%p333_p2) target bundleno = 79 (0x4f), region = 28 }
  0x14   : > { %263 = dma.vmem_to_smem (!%p261_p5), %s105_s13, 16, %s306_s16, [#allocation3]  }
  0x18   : > { %299 = dma.done.wait (%p264_p3), [#allocation3], 16  }
  0x19   : > { %301 = vsyncadd (%p264_p3), [#allocation3], 4294967280 }
  0x1a   : > { %130 = sfence }
  0x1b   : > { %p145_p0 = scmp.lt.s32.totalorder %s243_s10, 1  ;;  %s153_s17 = sld [smem:[#allocation2]] }
  0x1c   : > { %s252_s18 = sld [smem:[#allocation2 + $0x1]] }
  0x1d   : > { %s358_s10 = smov (!%p145_p0, %s243_s10), 1  ;;  %s253_s23 = sld [smem:[#allocation2 + $0x2]] }
  0x1e   : > { %s250_s19 = sshll.u32 %s358_s10, 3 }
  0x1f   : > { %s148_s22 = scalar_lea.vmem %s354_s1, %s250_s19  ;;  %s152_s26 = scalar_lea.vmem %s355_s2, %s250_s19 }
  0x20   : > { %v156_v0 = vld [vmem:[%s148_s22] sm:$0xff] }
  0x21   : > { %v157_v1 = vstv %s153_s17 }
  0x22   : > { %v158_v2 = vmul.f32 %v157_v1, %v156_v0  ;;  %v159_v3 = vstv %s252_s18 }
  0x23   : > { %v175_v15 = vstv %s253_s23 }
  0x24   : > { %v160_v4 = vsub.f32 %v158_v2, %v159_v3 }
  0x26   : > { %v162_v5 = vmin.f32 %v160_v4, 20.0  ;;  %vm161_vm1 = vcmp.gt.f32.partialorder %v160_v4, 20.0 }
  0x28   : > { %v163_v6 = vmul.f32 1.442695, %v162_v5 }
  0x2a   : > { %275 = vpow2.f32 %v163_v6 }
  0x37   : > { %v276_v7 = vpop.eup %275 }
  0x38   : > { %v165_v8 = vadd.f32 1.0, %v276_v7  ;;  %v168_v9 = vmul.f32 -0.5, %v276_v7  ;;  %v171_v11 = vand.u32 2147483647, %v276_v7 }
  0x3a   : > { %277 = vlog2.f32 %v165_v8  ;;  %v169_v10 = vadd.f32 1.0, %v168_v9  ;;  %vm172_vm0 = vcmp.lt.f32.partialorder %v171_v11, 0.0004427343 }
  0x3c   : > { %v170_v12 = vmul.f32 %v276_v7, %v169_v10 }
  0x47   : > { %v278_v13 = vpop.eup %277 }
  0x48   : > { %v167_v14 = vmul.f32 0.6931472, %v278_v13 }
  0x4a   : > { %v173_v16 = vsel %vm172_vm0, %v170_v12, %v167_v14 }
  0x4b   : > { %v174_v17 = vsel %vm161_vm1, %v160_v4, %v173_v16 }
  0x4c   : > { %v176_v18 = vmul.f32 %v175_v15, %v174_v17 }
  0x4e   : > { %177 = vst [vmem:[%s152_s26] sm:$0xff] %v176_v18 }
  0x4f PF: > { %s13_s9 = sadd.s32 1, %s304_s9  }
  0x50   : > { %p10_p1 = scmp.ge.s32.totalorder %s13_s9, 4  }
  0x52   :  { %12 = sbr.rel (!%p10_p1) target bundleno = 1 (0x1), region = 63 }
  0x57   :  { %197 = vsyncpa [#allocation3], 1 }
  0x58   :  { %199 = vsyncpa [#allocation3 + $0x1], 1 }

</bundles_post_ra>
